<compile_context>
chip_gen: v6e
topology: v6e:2x2x1
jax: 0.10.0
libtpu: 0.0.40
codegen_flags: <defaults>
</compile_context>

<pallas_src>
import jax
import jax.numpy as jnp
from jax.experimental import pallas as pl
from jax.experimental.pallas import tpu as pltpu


def _round_up(v, m):
    return ((v + m - 1) // m) * m


# ---------------------------------------------------------------------------
# Fast path kernel: whole problem resident in VMEM.
# No grid, no scratch, no pl.when -- dot + bias + ReLU, fused.
# ---------------------------------------------------------------------------
def _fused_small_kernel(x_ref, w_ref, b_ref, o_ref):
    # f32 x cast to bf16 on the VPU, bf16 weights, f32 accumulate on the MXU.
    y = jnp.dot(x_ref[...].astype(jnp.bfloat16), w_ref[...],
                preferred_element_type=jnp.float32)
    o_ref[...] = jnp.maximum(y + b_ref[...], 0.0).astype(o_ref.dtype)


# ---------------------------------------------------------------------------
# Tiled path kernel: grid (M, N, K), K innermost.  The output block index is
# k-invariant, so the f32 output tile stays VMEM-resident across k and we
# accumulate directly into o_ref (no scratch accumulator).
# ---------------------------------------------------------------------------
def _fused_grid_kernel(x_ref, w_ref, b_ref, o_ref):
    k = pl.program_id(2)

    @pl.when(k == 0)
    def _():
        o_ref[...] = jnp.zeros_like(o_ref)

    o_ref[...] += jnp.dot(x_ref[...].astype(jnp.bfloat16), w_ref[...],
                          preferred_element_type=jnp.float32)

    @pl.when(k == pl.num_programs(2) - 1)
    def _():
        # Bias + ReLU epilogue exactly once per output tile, in f32, in place.
        o_ref[...] = jnp.maximum(o_ref[...] + b_ref[...], 0.0)


_FAST_PATH_VMEM_BYTES = 8 * 1024 * 1024  # conservative across v5e/v6e/v7x


def linear_relu_padded(x, w_bf16, b_f32, n_out, *, force_grid=False):
    """relu(x @ W + b).

    x:      [M, K]   f32 (unpadded activations)
    w_bf16: [Kp, Np] bf16, pre-padded (Kp, Np multiples of 128), cached weight
    b_f32:  [1, Np]  f32, pre-padded bias
    Returns [M, n_out] f32.
    """
    M, K = x.shape
    Kp, Np = w_bf16.shape
    out_dtype = jnp.float32

    # ----------------- fast path: everything fits in VMEM -----------------
    Mp_s = _round_up(M, 8)
    small_bytes = Mp_s * Kp * 4 + Kp * Np * 2 + Np * 4 + Mp_s * Np * 4
    if (not force_grid) and small_bytes <= _FAST_PATH_VMEM_BYTES:
        xp = x if (Mp_s == M and Kp == K) else jnp.pad(
            x, ((0, Mp_s - M), (0, Kp - K)))
        out = pl.pallas_call(
            _fused_small_kernel,
            out_shape=jax.ShapeDtypeStruct((Mp_s, Np), out_dtype),
        )(xp, w_bf16, b_f32)
        return out[:M, :n_out]

    # ----------------------------- tiled path ------------------------------
    # N tile: largest 128-multiple dividing Np (Np is a multiple of 128).
    tn = next(t for t in (512, 256, 128) if Np % t == 0)
    # M tile.
    tm = min(512, _round_up(M, 8))
    Mp = _round_up(M, tm)
    # K tile: avoid splitting K unless it is very large.
    if Kp <= 2048:
        tk = Kp
    else:
        tk = next(t for t in (2048, 1024, 512, 256, 128) if Kp % t == 0)
    # v7x has 2 TensorCores; guarantee >= 2 parallel output blocks if possible.
    if (Mp // tm) * (Np // tn) < 2 and tn > 128:
        tn = 128

    xp = x if (Mp == M and Kp == K) else jnp.pad(x, ((0, Mp - M), (0, Kp - K)))

    grid = (Mp // tm, Np // tn, Kp // tk)

    # Per-step VMEM: double-buffered inputs + resident f32 output tile.
    vmem_bytes = 2 * (tm * tk * 4 + tk * tn * 2 + tn * 4) + tm * tn * 4
    vmem_limit = min(max(int(vmem_bytes * 3 // 2), 16 << 20), 48 << 20)

    cost = pl.CostEstimate(
        flops=2 * Mp * Np * Kp,
        transcendentals=0,
        bytes_accessed=(xp.size * 4 + w_bf16.size * 2 + b_f32.size * 4
                        + Mp * Np * 4),
    )

    out = pl.pallas_call(
        _fused_grid_kernel,
        out_shape=jax.ShapeDtypeStruct((Mp, Np), out_dtype),
        grid_spec=pltpu.PrefetchScalarGridSpec(
            num_scalar_prefetch=0,
            grid=grid,
            in_specs=[
                pl.BlockSpec((tm, tk), lambda i, j, k: (i, k)),   # x tile (f32)
                pl.BlockSpec((tk, tn), lambda i, j, k: (k, j)),   # W tile (bf16)
                pl.BlockSpec((1, tn), lambda i, j, k: (0, j)),    # bias tile
            ],
            out_specs=pl.BlockSpec((tm, tn), lambda i, j, k: (i, j)),
        ),
        compiler_params=pltpu.CompilerParams(
            dimension_semantics=("parallel", "parallel", "arbitrary"),
            vmem_limit_bytes=vmem_limit,
        ),
        cost_estimate=cost,
    )(xp, w_bf16, b_f32)

    return out[:M, :n_out]


# ---------------------------------------------------------------------------
# The wrapped inner module (deterministic synthetic Linear+ReLU)
# ---------------------------------------------------------------------------
class InnerLinearReLU:
    def __init__(self, hidden_in, hidden_out, key):
        kw, kb = jax.random.split(key)
        self.w = (jax.random.normal(kw, (hidden_in, hidden_out), jnp.float32)
                  * (1.0 / jnp.sqrt(hidden_in)))
        self.b = jax.random.normal(kb, (1, hidden_out), jnp.float32) * 0.01
        self.n_out = hidden_out
        # Static operands: pad + bf16-cast ONCE here, not per forward call.
        Kp = _round_up(hidden_in, 128)
        Np = _round_up(hidden_out, 128)
        self.w_bf16 = jnp.pad(
            self.w, ((0, Kp - hidden_in), (0, Np - hidden_out))
        ).astype(jnp.bfloat16)
        self.b_pad = jnp.pad(self.b, ((0, 0), (0, Np - hidden_out)))

    def __call__(self, x, *, force_grid=False):
        return linear_relu_padded(x, self.w_bf16, self.b_pad, self.n_out,
                                  force_grid=force_grid)


# ---------------------------------------------------------------------------
# DummyDDP: exact passthrough semantics of the PyTorch module
# ---------------------------------------------------------------------------
class DummyDDP:
    def __init__(self, module):
        self.module = module

    def __call__(self, *args, **kwargs):
        # forward(*args, **kwargs) -> self.module(*args, **kwargs)
        return self.module(*args, **kwargs)


if __name__ == "__main__":
    key = jax.random.PRNGKey(0)
    k_x1, k_mod1, k_x2, k_mod2 = jax.random.split(key, 4)

    # ---- Test 1: tiny FSDP-test-style shape (padded, fast VMEM path) ------
    batch1, hidden1 = 8, 32
    x1 = jax.random.normal(k_x1, (batch1, hidden1), jnp.float32)
    inner1 = InnerLinearReLU(hidden1, hidden1, k_mod1)
    model1 = DummyDDP(inner1)
    out1 = jax.block_until_ready(model1(x1))
    ref1 = jnp.maximum(x1 @ inner1.w + inner1.b, 0.0)
    assert out1.shape == (batch1, hidden1)
    assert jnp.allclose(out1, ref1, atol=5e-2, rtol=5e-2), float(
        jnp.max(jnp.abs(out1 - ref1)))

    # ---- Test 2: lane-dense MXU-friendly shape (fast VMEM path) -----------
    batch2, hidden2 = 128, 256
    x2 = jax.random.normal(k_x2, (batch2, hidden2), jnp.float32)
    inner2 = InnerLinearReLU(hidden2, hidden2, k_mod2)
    model2 = DummyDDP(inner2)
    out2 = jax.block_until_ready(model2(x2))
    ref2 = jnp.maximum(x2 @ inner2.w + inner2.b, 0.0)
    assert out2.shape == (batch2, hidden2)
    assert jnp.allclose(out2, ref2, atol=5e-2, rtol=5e-2), float(
        jnp.max(jnp.abs(out2 - ref2)))

    # ---- Test 3: exercise the tiled grid path on the same small shape -----
    out3 = jax.block_until_ready(model2(x2, force_grid=True))
    assert out3.shape == (batch2, hidden2)
    assert jnp.allclose(out3, ref2, atol=5e-2, rtol=5e-2), float(
        jnp.max(jnp.abs(out3 - ref2)))
    assert jnp.allclose(out3, out2, atol=2e-2, rtol=2e-2)

    print("KERNEL_OK")
</pallas_src>

<mosaic_0001>
module attributes {stable_mosaic.version = 11 : i64} {
  func.func @_fused_small_kernel(%arg0: memref<8x128xf32, #tpu.memory_space<vmem>>, %arg1: memref<128x128xbf16, #tpu.memory_space<vmem>>, %arg2: memref<1x128xf32, #tpu.memory_space<vmem>>, %arg3: memref<8x128xf32, #tpu.memory_space<vmem>>) attributes {dimension_semantics = [], scalar_prefetch = 0 : i64, scratch_operands = 0 : i64, tpu.core_type = #tpu.core_type<tc>} {
    %c0 = arith.constant 0 : index
    %c0_0 = arith.constant 0 : index
    %0 = vector.load %arg0[%c0, %c0_0] : memref<8x128xf32, #tpu.memory_space<vmem>>, vector<8x128xf32>
    %1 = arith.truncf %0 : vector<8x128xf32> to vector<8x128xbf16>
    %c0_1 = arith.constant 0 : index
    %c0_2 = arith.constant 0 : index
    %2 = vector.load %arg1[%c0_1, %c0_2] : memref<128x128xbf16, #tpu.memory_space<vmem>>, vector<128x128xbf16>
    %cst = arith.constant dense<0.000000e+00> : vector<8x128xf32>
    %3 = tpu.matmul %1, %2, %cst {dimension_numbers = #tpu.dot_dimension_numbers<[1], [0], [0], [1], [0, 0, 1, 1], [], []>} : vector<8x128xbf16>, vector<128x128xbf16>, vector<8x128xf32> -> vector<8x128xf32>
    %c0_3 = arith.constant 0 : index
    %c0_4 = arith.constant 0 : index
    %4 = vector.load %arg2[%c0_3, %c0_4] : memref<1x128xf32, #tpu.memory_space<vmem>>, vector<1x128xf32>
    %5 = vector.broadcast %4 : vector<1x128xf32> to vector<8x128xf32>
    %6 = arith.addf %3, %5 : vector<8x128xf32>
    %cst_5 = arith.constant 0.000000e+00 : f32
    %7 = vector.broadcast %cst_5 : f32 to vector<8x128xf32>
    %8 = arith.maximumf %6, %7 : vector<8x128xf32>
    %c0_6 = arith.constant 0 : index
    %c0_7 = arith.constant 0 : index
    %9 = vector.load %arg3[%c0_6, %c0_7] : memref<8x128xf32, #tpu.memory_space<vmem>>, vector<8x128xf32>
    tpu.vector_store %arg3[%c0_6, %c0_7], %8 {strides = array<i32>} : memref<8x128xf32, #tpu.memory_space<vmem>>, vector<8x128xf32>,
    return
  }
}

</mosaic_0001>

<bundles_post_ra>
// kernel: tpu_custom_call.1
= control target key start
LH: loop header
LB: loop body
LE: loop exit
PB: predicated region body
PF: predicated region fallthrough
CT: control target
= control target key end

     0   :  { %8 = vsyncpa [#allocation3], 0  ;;  %s331_s0 = inlined_call_operand.hbm [shape: f32[8,128], index: 0, kind: input, shape index: {}]   ;;  %s332_s1 = inlined_call_operand.hbm [shape: bf16[128,128], index: 1, kind: input, shape index: {}]   ;;  %s333_s2 = inlined_call_operand.vmem [shape: f32[1,128], index: 2, kind: input, shape index: {}]   ;;  %s334_s3 = inlined_call_operand.hbm [shape: f32[8,128], index: 3, kind: output, shape index: {}]  }
   0x1   :  { %9 = vsyncpa [#allocation6], 0 }
   0x2   :  { %10 = vsyncpa [#allocation4], 0  ;;  %s292_s12 = smov [#allocation2]   ;;  %s293_s14 = smov [#allocation5]  }
   0x3   :  { %s17_s13 = sshll.u32 %s292_s12, 4  ;;  %s26_s15 = sshll.u32 %s293_s14, 4  ;;  %s18_s13 = int_to_ptr.vmem [resolvable:$true] %s17_s13  ;;  %s27_s15 = int_to_ptr.vmem [resolvable:$true] %s26_s15 }
   0x4   :  { %s234_s16 = scalar_lea.vmem %s18_s13, 128  ;;  %p239_p1 = scmp.lt.s32.totalorder %s18_s13, %s18_s13 }
   0x5   :  { %p235_p0 = scmp.ne.s32.totalorder %s18_s13, %s234_s16  ;;  %p240_p2 = scmp.lt.s32.totalorder %s234_s16, %s234_s16 }
   0x7   :  { %p241_p3 = por %p240_p2, %p239_p1 }
   0x9   :  { %p242_p4 = pnand %p241_p3, %p235_p0 }
   0xb   :  { %245 = shalt.err (!%p242_p4)
}
   0xc   :  { %20 = dma.hbm_to_vmem [thread:$0]  %s331_s0, 128, %s18_s13, [#allocation3]  }
   0xd   :  { %s254_s19 = scalar_lea.vmem %s27_s15, 1024  ;;  %p259_p6 = scmp.lt.s32.totalorder %s27_s15, %s27_s15 }
   0xe   :  { %p255_p5 = scmp.ne.s32.totalorder %s27_s15, %s254_s19  ;;  %p260_p7 = scmp.lt.s32.totalorder %s254_s19, %s254_s19 }
  0x10   :  { %p261_p8 = por %p260_p7, %p259_p6 }
  0x12   :  { %p262_p9 = pnand %p261_p8, %p255_p5 }
  0x14   :  { %265 = shalt.err (!%p262_p9)
}
  0x15   :  { %s294_s20 = smov 64   ;;  %s295_s21 = smov 4  }
  0x16   :  { %32 = dma.hbm_to_vmem [thread:$0]  %s332_s1, 1024, %s27_s15, [#allocation6], %s294_s20, %s294_s20, %s295_s21  }
  0x17   :  { %286 = dma.done.wait [#allocation3], 128  }
  0x18   :  { %287 = vsyncadd [#allocation3], 4294967168 }
  0x19   :  { %288 = dma.done.wait [#allocation6], 1024  }
  0x1a   :  { %289 = vsyncadd [#allocation6], 4294966272  ;;  %v296_v0 = vmov 0.0   ;;  %vm297_vm0 = vmmov 0   ;;  %v218_v1 = vld [vmem:[#allocation5 + $0x38] sm:$0xff]   ;;  %v219_v2 = vld [vmem:[#allocation5 + $0x30] sm:$0xff]  }
  0x1b   :  { %191 = vmatprep.subr.bf16.mxu0 %v296_v0  ;;  %207 = vmatprep.mubr.msk.bf16.mxu0 %vm297_vm0, %v296_v0  ;;  %v220_v3 = vld [vmem:[#allocation5 + $0x28] sm:$0xff]   ;;  %v221_v4 = vld [vmem:[#allocation5 + $0x20] sm:$0xff]   ;;  %v222_v5 = vld [vmem:[#allocation5 + $0x18] sm:$0xff]   ;;  %s298_s24 = smov [#allocation7]  }
  0x1c   :  { %192 = vmatpush3.bf16.msra.mxu0 %v218_v1  ;;  %v223_v6 = vld [vmem:[#allocation5 + $0x10] sm:$0xff]   ;;  %v224_v7 = vld [vmem:[#allocation5 + $0x8] sm:$0xff]   ;;  %v225_v8 = vld [vmem:[#allocation5] sm:$0xff]   ;;  %s163_s25 = sshll.u32 %s298_s24, 4  ;;  %s164_s25 = int_to_ptr.vmem [resolvable:$true] %s163_s25 }
  0x1d   :  { %193 = vmatprep.subr.bf16.mxu0 %v296_v0  ;;  %v42_v9 = vld [vmem:[#allocation2] sm:$0xff]  ;;  %s266_s26 = scalar_lea.vmem %s164_s25, 128  ;;  %p271_p11 = scmp.lt.s32.totalorder %s164_s25, %s164_s25 }
  0x1e   :  { %v43_v10 = vpack.c.bf16 %v42_v9, %v42_v9  ;;  %v173_v11 = vld [vmem:[%s333_s2] ss:$0 sm:$0xff]  ;;  %p267_p10 = scmp.ne.s32.totalorder %s164_s25, %s266_s26  ;;  %p272_p12 = scmp.lt.s32.totalorder %s266_s26, %s266_s26 }
  0x20   :  { %194 = vmatpush3.bf16.msra.mxu0 %v219_v2  ;;  %p273_p13 = por %p272_p12, %p271_p11 }
  0x21   :  { %195 = vmatprep.subr.bf16.mxu0 %v296_v0 }
  0x22   :  { %p274_p0 = pnand %p273_p13, %p267_p10 }
  0x24   :  { %196 = vmatpush3.bf16.msra.mxu0 %v220_v3 }
  0x25   :  { %197 = vmatprep.subr.bf16.mxu0 %v296_v0 }
  0x28   :  { %198 = vmatpush3.bf16.msra.mxu0 %v221_v4 }
  0x29   :  { %199 = vmatprep.subr.bf16.mxu0 %v296_v0 }
  0x2c   :  { %200 = vmatpush3.bf16.msra.mxu0 %v222_v5 }
  0x2d   :  { %201 = vmatprep.subr.bf16.mxu0 %v296_v0 }
  0x30   :  { %202 = vmatpush3.bf16.msra.mxu0 %v223_v6 }
  0x31   :  { %203 = vmatprep.subr.bf16.mxu0 %v296_v0 }
  0x34   :  { %204 = vmatpush3.bf16.msra.mxu0 %v224_v7 }
  0x35   :  { %205 = vmatprep.subr.bf16.mxu0 %v296_v0 }
  0x38   :  { %206 = vmatpush3.bf16.msra.mxu0 %v225_v8 }
  0x3b   :  { %208 = vmatmul.mubr.bf16.vlgmr.msra.gmra.mxu0 %v43_v10 }
  0xfb   :  { %v149_v12 = vpop.f32.mrf.mxu0 }
  0xfc   :  { %v150_v13 = vadd.f32 %v173_v11, %v149_v12 }
  0xfd   :  { %v209_v14 = vpop.f32.mrf.mxu0 }
  0xfe   :  { %v155_v15 = vmax.f32 %v150_v13, 0.0 }
  0xff   :  { %v152_v16 = vpop.f32.mrf.mxu0 }
 0x100   :  { %156 = vst [vmem:[#allocation7] sm:$0xff] %v155_v15 }
 0x101   :  { %v210_v17 = vpop.f32.mrf.mxu0 }
 0x102   :  { %277 = shalt.err (!%p274_p0)
}
 0x103   :  { %166 = dma.vmem_to_hbm [thread:$0]  %s164_s25, 128, %s334_s3, [#allocation4]  }
 0x104   :  { %290 = dma.done.wait [#allocation4], 128  }
 0x105   :  { %291 = vsyncadd [#allocation4], 4294967168 }
 0x106   :  { %170 = vsyncpa [#allocation3], 1 }
 0x107   :  { %171 = vsyncpa [#allocation6], 1 }
 0x108   :  { %172 = vsyncpa [#allocation4], 1 }

</bundles_post_ra>
